<compile_context>
chip_gen: v7x
topology: tpu7x:2x2x1
jax: 0.10.0
libtpu: 0.0.40
codegen_flags: <defaults>
</compile_context>

<pallas_src>
import functools

import jax
import jax.numpy as jnp
from jax.experimental import pallas as pl
from jax.experimental.pallas import tpu as pltpu

# ~8 MiB of input per grid step: amortizes the ~0.35 us per-step overhead even
# at v7x HBM rates, while pass 2's double-buffered in+out tiles stay under the
# explicit scoped-VMEM limit below (which itself fits v7x's 64 MiB physical).
_TARGET_TILE_BYTES = 8 << 20
_VMEM_LIMIT_BYTES = 48 << 20
# Leading ("parallel") chunk axis of the pass-1 grid; lets multi-core chips
# (v7x) shard the reduction across TensorCores.  No-op cost on v5e/v6e.
_NUM_CHUNKS = 2


def _round_up(v, m):
    return -(-v // m) * m


def _reduce_kernel(pilot_ref, x_ref, sum_ref, sumsq_ref, *,
                   tile_rows, n_rows, tiles_per_chunk):
    """Pass 1: per-chunk accumulation of shifted sum and sum-of-squares."""
    c = pl.program_id(0)
    t = pl.program_id(1)

    @pl.when(t == 0)
    def _():
        sum_ref[...] = jnp.zeros_like(sum_ref)
        sumsq_ref[...] = jnp.zeros_like(sumsq_ref)

    # Global row-tile index for this step (may land past the real tile count
    # for the clamped tail of the last chunk -> fully masked below).
    gt = c * tiles_per_chunk + t
    valid = n_rows - gt * tile_rows

    x = x_ref[...].astype(jnp.float32)
    pilot = pilot_ref[0]
    row_ids = jax.lax.broadcasted_iota(jnp.int32, x.shape, 0)
    # Mask rows past the end of the array (ragged-last-tile reads are
    # unspecified) and shift by the pilot value so the one-pass variance is
    # well conditioned even when |mean| >> std.
    d = jnp.where(row_ids < valid, x - pilot, 0.0)

    psum = jnp.sum(d, axis=0, keepdims=True)        # (1, C) per-column partial
    psumsq = jnp.sum(d * d, axis=0, keepdims=True)  # (1, C)
    # (1, C) broadcasts over the sublane-aligned (8, C) accumulator block; the
    # wrapper only reads row 0 of each chunk, so the replication is harmless.
    sum_ref[...] = sum_ref[...] + psum
    sumsq_ref[...] = sumsq_ref[...] + psumsq


def _normalize_kernel(coeffs_ref, x_ref, o_ref):
    """Pass 2: out = x * scale + shift.  Pure load-FMA-store stream."""
    scale = coeffs_ref[0]
    shift = coeffs_ref[1]
    o_ref[...] = (x_ref[...].astype(jnp.float32) * scale + shift
                  ).astype(o_ref.dtype)


def layer_norm(x, weight, bias, eps=1e-5, *, max_tile_rows=None):
    """x: [..., C] float array; weight/bias: shape-(1,) arrays (scalar affine)."""
    orig_shape = x.shape
    x2d = x.reshape(1, -1) if x.ndim == 1 else x.reshape(-1, x.shape[-1])
    n_rows, n_cols = x2d.shape
    total = x.size
    itemsize = jnp.dtype(x.dtype).itemsize

    # Byte-based tile sizing: ~_TARGET_TILE_BYTES of input per DMA regardless
    # of dtype; row tiles are a multiple of 8 (sublane) and capped near n_rows.
    tile_rows = max((_TARGET_TILE_BYTES // (n_cols * itemsize)) // 8 * 8, 8)
    tile_rows = min(tile_rows, _round_up(n_rows, 8))
    if max_tile_rows is not None:
        tile_rows = max(min(tile_rows, max_tile_rows) // 8 * 8, 8)

    num_tiles = pl.cdiv(n_rows, tile_rows)
    num_chunks = min(_NUM_CHUNKS, num_tiles)
    tiles_per_chunk = pl.cdiv(num_tiles, num_chunks)

    # Pilot value for the shifted (well-conditioned) one-pass variance.
    pilot = x2d[0, 0].astype(jnp.float32)
    pilot_arr = pilot.reshape(1)

    reduce_kernel = functools.partial(
        _reduce_kernel, tile_rows=tile_rows, n_rows=n_rows,
        tiles_per_chunk=tiles_per_chunk)

    def x_index_map(c, t):
        # Clamp so the tail of the last chunk re-reads the final in-bounds
        # tile; its contribution is fully masked in-kernel.
        return (jnp.minimum(c * tiles_per_chunk + t, num_tiles - 1), 0)

    # --- Pass 1: streamed reduction (chunk axis parallel across cores). ---
    sums, sumsqs = pl.pallas_call(
        reduce_kernel,
        out_shape=(jax.ShapeDtypeStruct((num_chunks * 8, n_cols), jnp.float32),
                   jax.ShapeDtypeStruct((num_chunks * 8, n_cols), jnp.float32)),
        grid=(num_chunks, tiles_per_chunk),
        in_specs=[
            pl.BlockSpec(memory_space=pltpu.MemorySpace.SMEM),   # pilot (1,)
            pl.BlockSpec((tile_rows, n_cols), x_index_map),      # x row tile
        ],
        out_specs=(pl.BlockSpec((8, n_cols), lambda c, t: (c, 0)),
                   pl.BlockSpec((8, n_cols), lambda c, t: (c, 0))),
        compiler_params=pltpu.CompilerParams(
            dimension_semantics=("parallel", "arbitrary"),
            vmem_limit_bytes=_VMEM_LIMIT_BYTES),
        cost_estimate=pl.CostEstimate(
            flops=3 * total, transcendentals=0,
            bytes_accessed=total * itemsize),
    )(pilot_arr, x2d)

    # --- Scalar finalize in plain XLA (off pass 2's per-tile critical path). --
    inv_n = 1.0 / float(total)
    sum_d = jnp.sum(sums.reshape(num_chunks, 8, n_cols)[:, 0, :])
    sumsq_d = jnp.sum(sumsqs.reshape(num_chunks, 8, n_cols)[:, 0, :])
    mean_d = sum_d * inv_n
    var = jnp.maximum(sumsq_d * inv_n - mean_d * mean_d, 0.0)
    std = jnp.sqrt(var)
    # NB: eps added to std (NOT inside the sqrt) to match the PyG module.
    inv = 1.0 / (std + float(eps))
    scale = weight.astype(jnp.float32)[0] * inv            # gamma / (std+eps)
    shift = bias.astype(jnp.float32)[0] - (pilot + mean_d) * scale
    coeffs = jnp.stack([scale, shift])                      # (2,) f32 -> SMEM

    # --- Pass 2: streamed normalize (embarrassingly parallel over tiles). ---
    # NOTE(v7x): if profiling shows a single TC doing all steps, switch this
    # axis to pltpu.CORE_PARALLEL.
    out2d = pl.pallas_call(
        _normalize_kernel,
        out_shape=jax.ShapeDtypeStruct((n_rows, n_cols), x.dtype),
        grid=(num_tiles,),
        in_specs=[
            pl.BlockSpec(memory_space=pltpu.MemorySpace.SMEM),   # (scale, shift)
            pl.BlockSpec((tile_rows, n_cols), lambda i: (i, 0)),
        ],
        out_specs=pl.BlockSpec((tile_rows, n_cols), lambda i: (i, 0)),
        compiler_params=pltpu.CompilerParams(
            dimension_semantics=("parallel",),
            vmem_limit_bytes=_VMEM_LIMIT_BYTES),
        cost_estimate=pl.CostEstimate(
            flops=2 * total, transcendentals=0,
            bytes_accessed=2 * total * itemsize),
    )(coeffs, x2d)

    return out2d.reshape(orig_shape)


def _reference(x, weight, bias, eps=1e-5):
    xm = x - jnp.mean(x)
    out = xm / (jnp.std(x) + eps)        # biased std, eps added to std
    return out * weight[0] + bias[0]


if __name__ == "__main__":
    k1, k2 = jax.random.split(jax.random.PRNGKey(0))

    # reset_parameters(): ones / zeros, each of shape (1,) per the PyTorch
    # __init__ (scalar affine).
    weight = jnp.ones((1,), dtype=jnp.float32)
    bias = jnp.zeros((1,), dtype=jnp.float32)

    # Test 1: natural single-tile path. N nodes, C = in_channels.
    N, C = 64, 32
    x = jax.random.normal(k1, (N, C), dtype=jnp.float32)
    out = jax.block_until_ready(layer_norm(x, weight, bias, eps=1e-5))
    ref = _reference(x, weight, bias, eps=1e-5)
    assert out.shape == (N, C) and out.dtype == x.dtype
    assert jnp.allclose(out, ref, atol=1e-5, rtol=1e-5)

    # Test 2: force tiny tiles to exercise the multi-tile / multi-chunk /
    # ragged-tail masking path, with a shifted mean to check conditioning.
    N2, C2 = 100, 32
    x2 = jax.random.normal(k2, (N2, C2), dtype=jnp.float32) * 1.5 + 3.0
    out2 = jax.block_until_ready(
        layer_norm(x2, weight, bias, eps=1e-5, max_tile_rows=16))
    ref2 = _reference(x2, weight, bias, eps=1e-5)
    assert out2.shape == (N2, C2) and out2.dtype == x2.dtype
    assert jnp.allclose(out2, ref2, atol=1e-4, rtol=1e-4)

    print("KERNEL_OK")
</pallas_src>

<mosaic_0001>
module attributes {stable_mosaic.version = 11 : i64} {
  func.func @_reduce_kernel(%arg0: i32, %arg1: i32, %arg2: memref<1xf32, #tpu.memory_space<smem>>, %arg3: memref<64x32xf32, #tpu.memory_space<vmem>>, %arg4: memref<8x32xf32, #tpu.memory_space<vmem>>, %arg5: memref<8x32xf32, #tpu.memory_space<vmem>>) attributes {dimension_semantics = [#tpu.dimension_semantics<parallel>, #tpu.dimension_semantics<arbitrary>], iteration_bounds = array<i64: 1, 1>, scalar_prefetch = 0 : i64, scratch_operands = 0 : i64, tpu.core_type = #tpu.core_type<tc>, window_params = [{transform_indices = @transform_0, window_bounds = array<i64: 1>}, {transform_indices = @transform_1, window_bounds = array<i64: 64, 32>}, {transform_indices = @transform_2, window_bounds = array<i64: 8, 32>}, {transform_indices = @transform_3, window_bounds = array<i64: 8, 32>}]} {
    %c0_i32 = arith.constant 0 : i32
    %0 = arith.cmpi eq, %arg1, %c0_i32 : i32
    %1 = arith.extui %0 : i1 to i32
    %c0_i32_0 = arith.constant 0 : i32
    %2 = arith.cmpi ne, %1, %c0_i32_0 : i32
    scf.if %2 {
      %cst_14 = arith.constant 0.000000e+00 : f32
      %29 = vector.broadcast %cst_14 : f32 to vector<8x32xf32>
      %c0_15 = arith.constant 0 : index
      %c0_16 = arith.constant 0 : index
      %30 = vector.load %arg4[%c0_15, %c0_16] : memref<8x32xf32, #tpu.memory_space<vmem>>, vector<8x32xf32>
      tpu.vector_store %arg4[%c0_15, %c0_16], %29 {strides = array<i32>} : memref<8x32xf32, #tpu.memory_space<vmem>>, vector<8x32xf32>,
      %cst_17 = arith.constant 0.000000e+00 : f32
      %31 = vector.broadcast %cst_17 : f32 to vector<8x32xf32>
      %c0_18 = arith.constant 0 : index
      %c0_19 = arith.constant 0 : index
      %32 = vector.load %arg5[%c0_18, %c0_19] : memref<8x32xf32, #tpu.memory_space<vmem>>, vector<8x32xf32>
      tpu.vector_store %arg5[%c0_18, %c0_19], %31 {strides = array<i32>} : memref<8x32xf32, #tpu.memory_space<vmem>>, vector<8x32xf32>,
    } else {
    }
    %c1_i32 = arith.constant 1 : i32
    %3 = arith.muli %arg0, %c1_i32 : i32
    %4 = arith.addi %3, %arg1 : i32
    %c64_i32 = arith.constant 64 : i32
    %5 = arith.muli %4, %c64_i32 : i32
    %c64_i32_1 = arith.constant 64 : i32
    %6 = arith.subi %c64_i32_1, %5 : i32
    %c0 = arith.constant 0 : index
    %c0_2 = arith.constant 0 : index
    %7 = vector.load %arg3[%c0, %c0_2] : memref<64x32xf32, #tpu.memory_space<vmem>>, vector<64x32xf32>
    %c0_3 = arith.constant 0 : index
    %8 = memref.load %arg2[%c0_3] : memref<1xf32, #tpu.memory_space<smem>>
    %9 = tpu.iota {dimensions = array<i32: 0>} : vector<64x32xi32>
    %10 = vector.broadcast %6 : i32 to vector<64x32xi32>
    %11 = arith.cmpi slt, %9, %10 : vector<64x32xi32>
    %12 = vector.broadcast %8 : f32 to vector<64x32xf32>
    %13 = arith.subf %7, %12 : vector<64x32xf32>
    %cst = arith.constant 0.000000e+00 : f32
    %14 = vector.broadcast %cst : f32 to vector<64x32xf32>
    %15 = arith.select %11, %13, %14 : vector<64x32xi1>, vector<64x32xf32>
    %cst_4 = arith.constant dense<0.000000e+00> : vector<32xf32>
    %16 = vector.multi_reduction <add>, %15, %cst_4 [0] : vector<64x32xf32> to vector<32xf32>
    %17 = vector.shape_cast %16 : vector<32xf32> to vector<1x32xf32>
    %18 = arith.mulf %15, %15 : vector<64x32xf32>
    %cst_5 = arith.constant dense<0.000000e+00> : vector<32xf32>
    %19 = vector.multi_reduction <add>, %18, %cst_5 [0] : vector<64x32xf32> to vector<32xf32>
    %20 = vector.shape_cast %19 : vector<32xf32> to vector<1x32xf32>
    %c0_6 = arith.constant 0 : index
    %c0_7 = arith.constant 0 : index
    %21 = vector.load %arg4[%c0_6, %c0_7] : memref<8x32xf32, #tpu.memory_space<vmem>>, vector<8x32xf32>
    %22 = vector.broadcast %17 : vector<1x32xf32> to vector<8x32xf32>
    %23 = arith.addf %21, %22 : vector<8x32xf32>
    %c0_8 = arith.constant 0 : index
    %c0_9 = arith.constant 0 : index
    %24 = vector.load %arg4[%c0_8, %c0_9] : memref<8x32xf32, #tpu.memory_space<vmem>>, vector<8x32xf32>
    tpu.vector_store %arg4[%c0_8, %c0_9], %23 {strides = array<i32>} : memref<8x32xf32, #tpu.memory_space<vmem>>, vector<8x32xf32>,
    %c0_10 = arith.constant 0 : index
    %c0_11 = arith.constant 0 : index
    %25 = vector.load %arg5[%c0_10, %c0_11] : memref<8x32xf32, #tpu.memory_space<vmem>>, vector<8x32xf32>
    %26 = vector.broadcast %20 : vector<1x32xf32> to vector<8x32xf32>
    %27 = arith.addf %25, %26 : vector<8x32xf32>
    %c0_12 = arith.constant 0 : index
    %c0_13 = arith.constant 0 : index
    %28 = vector.load %arg5[%c0_12, %c0_13] : memref<8x32xf32, #tpu.memory_space<vmem>>, vector<8x32xf32>
    tpu.vector_store %arg5[%c0_12, %c0_13], %27 {strides = array<i32>} : memref<8x32xf32, #tpu.memory_space<vmem>>, vector<8x32xf32>,
    return
  }
  func.func @transform_0(%arg0: i32, %arg1: i32) -> i32 {
    %c0_i32 = arith.constant 0 : i32
    %c0_i32_0 = arith.constant 0 : i32
    return %c0_i32 : i32
  }
  func.func @transform_1(%arg0: i32, %arg1: i32) -> (i32, i32) {
    %c1_i32 = arith.constant 1 : i32
    %0 = arith.muli %arg0, %c1_i32 : i32
    %1 = arith.addi %0, %arg1 : i32
    %c0_i32 = arith.constant 0 : i32
    %2 = arith.minsi %1, %c0_i32 : i32
    %c0_i32_0 = arith.constant 0 : i32
    %c0_i32_1 = arith.constant 0 : i32
    return %2, %c0_i32_0 : i32, i32
  }
  func.func @transform_2(%arg0: i32, %arg1: i32) -> (i32, i32) {
    %c0_i32 = arith.constant 0 : i32
    %c0_i32_0 = arith.constant 0 : i32
    return %arg0, %c0_i32 : i32, i32
  }
  func.func @transform_3(%arg0: i32, %arg1: i32) -> (i32, i32) {
    %c0_i32 = arith.constant 0 : i32
    %c0_i32_0 = arith.constant 0 : i32
    return %arg0, %c0_i32 : i32, i32
  }
}

</mosaic_0001>

<bundles_post_ra>
// kernel: tpu_custom_call.1
= control target key start
LH: loop header
LB: loop body
LE: loop exit
PB: predicated region body
PF: predicated region fallthrough
CT: control target
= control target key end

     0   :  { %10 = vsyncpa [#allocation4], 0  ;;  %vm52_vm0 = vcmask 261120   ;;  %v244_v4 = vmov 0.0   ;;  %s338_s0 = inlined_call_operand.<no memory space> [shape: f32[1], index: 0, kind: input, shape index: {}]   ;;  %s339_s1 = inlined_call_operand.vmem [shape: f32[64,32], index: 1, kind: input, shape index: {}]   ;;  %s340_s2 = inlined_call_operand.hbm [shape: f32[8,32], index: 2, kind: output, shape index: {0}]   ;;  %s341_s3 = inlined_call_operand.hbm [shape: f32[8,32], index: 3, kind: output, shape index: {1}]  }
   0x1   :  { %v58_v0 = vld [vmem:[%s339_s1] sm:$0xff]  ;;  %v59_v1 = vld [vmem:[%s339_s1 + $0x8] sm:$0xff]  ;;  %v60_v2 = vld [vmem:[%s339_s1 + $0x10] sm:$0xff]  ;;  %v85_v3 = vstv %s338_s0  ;;  %53 = vst.msk [vmem:[#allocation3] sm:$0xff] %vm52_vm0, %v244_v4 }
   0x2   :  { %54 = vst.msk [vmem:[#allocation5] sm:$0xff] %vm52_vm0, %v244_v4  ;;  %v61_v5 = vld [vmem:[%s339_s1 + $0x18] sm:$0xff]  ;;  %v62_v6 = vld [vmem:[%s339_s1 + $0x20] sm:$0xff]  ;;  %v86_v7 = vsub.f32 %v58_v0, %v85_v3  ;;  %v87_v8 = vsub.f32 %v59_v1, %v85_v3  ;;  %v63_v9 = vld [vmem:[%s339_s1 + $0x28] sm:$0xff]  ;;  %v88_v10 = vsub.f32 %v60_v2, %v85_v3 }
   0x3   :  { %v89_v11 = vsub.f32 %v61_v5, %v85_v3 }
   0x4   :  { %11 = vsyncpa [#allocation6], 0  ;;  %v90_v12 = vsub.f32 %v62_v6, %v85_v3  ;;  %v103_v13 = vsel %vm52_vm0, %v86_v7, 0.0  ;;  %v104_v14 = vsel %vm52_vm0, %v87_v8, 0.0  ;;  %v64_v15 = vld [vmem:[%s339_s1 + $0x30] sm:$0xff]  ;;  %v106_v17 = vsel %vm52_vm0, %v88_v10, 0.0 }
   0x5   :  { %v105_v16 = vadd.f32 %v104_v14, %v103_v13  ;;  %v91_v18 = vsub.f32 %v63_v9, %v85_v3  ;;  %v108_v19 = vsel %vm52_vm0, %v89_v11, 0.0  ;;  %v124_v20 = vmul.f32 %v86_v7, %v86_v7  ;;  %v65_v25 = vld [vmem:[%s339_s1 + $0x38] sm:$0xff]  ;;  %s245_s1 = smov [#allocation3]   ;;  %s246_s30 = smov [#allocation5]  }
   0x6   :  { %v125_v22 = vmul.f32 %v87_v8, %v87_v8  ;;  %v126_v23 = vmul.f32 %v88_v10, %v88_v10  ;;  %v127_v24 = vmul.f32 %v89_v11, %v89_v11  ;;  %v92_v26 = vsub.f32 %v64_v15, %v85_v3  ;;  %s165_s29 = sshll.u32 %s245_s1, 4  ;;  %s175_s4 = sshll.u32 %s246_s30, 4  ;;  %s166_s29 = int_to_ptr.vmem [resolvable:$true] %s165_s29  ;;  %s176_s4 = int_to_ptr.vmem [resolvable:$true] %s175_s4 }
   0x7   :  { %v107_v21 = vadd.f32 %v106_v17, %v105_v16  ;;  %v110_v27 = vsel %vm52_vm0, %v90_v12, 0.0  ;;  %v128_v28 = vmul.f32 %v90_v12, %v90_v12  ;;  %v132_v30 = vsel %vm52_vm0, %v124_v20, 0.0  ;;  %s196_s5 = scalar_lea.vmem %s166_s29, 128  ;;  %p201_p1 = scmp.lt.s32.totalorder %s166_s29, %s166_s29 }
   0x8   :  { %v133_v31 = vsel %vm52_vm0, %v125_v22, 0.0  ;;  %v135_v32 = vsel %vm52_vm0, %v126_v23, 0.0  ;;  %v112_v33 = vsel %vm52_vm0, %v91_v18, 0.0  ;;  %v93_v35 = vsub.f32 %v65_v25, %v85_v3  ;;  %v153_v63 = vld [vmem:[#allocation3] sm:$0xff]  ;;  %p197_p0 = scmp.ne.s32.totalorder %s166_s29, %s196_s5  ;;  %p202_p2 = scmp.lt.s32.totalorder %s196_s5, %s196_s5 }
   0x9   :  { %v109_v29 = vadd.f32 %v108_v19, %v107_v21  ;;  %v134_v34 = vadd.f32 %v133_v31, %v132_v30  ;;  %v129_v37 = vmul.f32 %v91_v18, %v91_v18  ;;  %v137_v38 = vsel %vm52_vm0, %v127_v24, 0.0  ;;  %v156_v5 = vld [vmem:[#allocation5] sm:$0xff] }
   0xa   :  { %v114_v39 = vsel %vm52_vm0, %v92_v26, 0.0  ;;  %v130_v42 = vmul.f32 %v92_v26, %v92_v26  ;;  %v139_v43 = vsel %vm52_vm0, %v128_v28, 0.0  ;;  %v116_v44 = vsel %vm52_vm0, %v93_v35, 0.0  ;;  %p203_p3 = por %p202_p2, %p201_p1 }
   0xb   :  { %v111_v36 = vadd.f32 %v110_v27, %v109_v29  ;;  %v136_v40 = vadd.f32 %v135_v32, %v134_v34  ;;  %v131_v47 = vmul.f32 %v93_v35, %v93_v35  ;;  %v141_v48 = vsel %vm52_vm0, %v129_v37, 0.0 }
   0xc   :  { %v143_v51 = vsel %vm52_vm0, %v130_v42, 0.0  ;;  %p204_p4 = pnand %p203_p3, %p197_p0 }
   0xd   :  { %v113_v41 = vadd.f32 %v112_v33, %v111_v36  ;;  %v138_v45 = vadd.f32 %v137_v38, %v136_v40  ;;  %v145_v54 = vsel %vm52_vm0, %v131_v47, 0.0 }
   0xf   :  { %v115_v46 = vadd.f32 %v114_v39, %v113_v41  ;;  %v140_v49 = vadd.f32 %v139_v43, %v138_v45 }
  0x11   :  { %v117_v50 = vadd.f32 %v116_v44, %v115_v46  ;;  %v142_v52 = vadd.f32 %v141_v48, %v140_v49 }
  0x13   :  { %v118_v53 = vrot.slane %v117_v50, 4  ;;  %v144_v55 = vadd.f32 %v143_v51, %v142_v52 }
  0x15   :  { %v119_v56 = vadd.f32 %v118_v53, %v117_v50  ;;  %v146_v57 = vadd.f32 %v145_v54, %v144_v55 }
  0x17   :  { %v120_v58 = vrot.slane %v119_v56, 2  ;;  %v147_v59 = vrot.slane %v146_v57, 4 }
  0x19   :  { %v121_v60 = vadd.f32 %v120_v58, %v119_v56  ;;  %v148_v61 = vadd.f32 %v147_v59, %v146_v57 }
  0x1b   :  { %v122_v62 = vrot.slane %v121_v60, 1  ;;  %v149_v0 = vrot.slane %v148_v61, 2 }
  0x1d   :  { %v123_v1 = vadd.f32 %v122_v62, %v121_v60  ;;  %v150_v2 = vadd.f32 %v149_v0, %v148_v61 }
  0x1f   :  { %v154_v3 = vadd.f32 %v153_v63, %v123_v1  ;;  %v151_v4 = vrot.slane %v150_v2, 1 }
  0x21   :  { %155 = vst.msk [vmem:[#allocation3] sm:$0xff] %vm52_vm0, %v154_v3  ;;  %v152_v6 = vadd.f32 %v151_v4, %v150_v2 }
  0x22   :  { %207 = shalt.err (!%p204_p4)
}
  0x23   :  { %s208_s8 = scalar_lea.hbm %s340_s2, 128 }
  0x24   :  { %p209_p5 = scmp.ne.s32.totalorder %s340_s2, %s208_s8  ;;  %p212_p6 = scmp.lt.u32.totalorder %s208_s8, %s340_s2 }
  0x26   :  { %p214_p7 = pnand %p212_p6, %p209_p5 }
  0x28   :  { %217 = shalt.err (!%p214_p7)
}
  0x29   :  { %168 = dma.vmem_to_hbm [thread:$0]  %s166_s29, 128, %s340_s2, [#allocation4]   ;;  %v157_v7 = vadd.f32 %v156_v5, %v152_v6 }
  0x2a   :  { %s218_s15 = scalar_lea.vmem %s176_s4, 128  ;;  %p223_p9 = scmp.lt.s32.totalorder %s176_s4, %s176_s4 }
  0x2b   :  { %158 = vst.msk [vmem:[#allocation5] sm:$0xff] %vm52_vm0, %v157_v7  ;;  %p219_p8 = scmp.ne.s32.totalorder %s176_s4, %s218_s15  ;;  %p224_p10 = scmp.lt.s32.totalorder %s218_s15, %s218_s15 }
  0x2d   :  { %p225_p11 = por %p224_p10, %p223_p9 }
  0x2f   :  { %p226_p12 = pnand %p225_p11, %p219_p8 }
  0x31   :  { %229 = shalt.err (!%p226_p12)
}
  0x32   :  { %s230_s18 = scalar_lea.hbm %s341_s3, 128 }
  0x33   :  { %p231_p13 = scmp.ne.s32.totalorder %s341_s3, %s230_s18  ;;  %p234_p0 = scmp.lt.u32.totalorder %s230_s18, %s341_s3 }
  0x35   :  { %p236_p1 = pnand %p234_p0, %p231_p13 }
  0x37   :  { %239 = shalt.err (!%p236_p1)
}
  0x38   :  { %178 = dma.vmem_to_hbm [thread:$0]  %s176_s4, 128, %s341_s3, [#allocation6]  }
  0x39   :  { %240 = dma.done.wait [#allocation4], 128  }
  0x3a   :  { %241 = vsyncadd [#allocation4], 4294967168 }
  0x3b   :  { %242 = dma.done.wait [#allocation6], 128  }
  0x3c   :  { %243 = vsyncadd [#allocation6], 4294967168 }
  0x3d   :  { %185 = vsyncpa [#allocation4], 1 }
  0x3e   :  { %186 = vsyncpa [#allocation6], 1 }

</bundles_post_ra>
